<compile_context>
chip_gen: v5e
topology: v5e:2x2
jax: 0.10.0
libtpu: 0.0.40
codegen_flags: <defaults>
</compile_context>

<pallas_src>
import functools
import math

import jax
import jax.numpy as jnp
from jax.experimental import pallas as pl
from jax.experimental.pallas import tpu as pltpu  # noqa: F401  (kept for TPU backend symmetry)


def _round_up(x, m):
    return ((x + m - 1) // m) * m


def _fused_gru_kernel(x_ref, h_ref, wx_ref, wh_ref, b_ref, out_ref, *,
                      num_layers, hidden_size, hidden_rows):
    """All GRU layers fused in one invocation (layers unrolled at trace time).

    x_ref  : (Bp, Xp)      f32  -- layer-0 input, zero padded to Xp columns
    h_ref  : (L, Bp, Hr)   f32  -- old hidden states (zero padded batch / rows)
    wx_ref : (L, Xp, Gp)   bf16 -- input->gates weights, gate cols [r | z | gi_n | 0]
    wh_ref : (L, Hr, Gp)   bf16 -- hidden->gates weights, gate cols [r | z | 0 | gh_n]
    b_ref  : (L, 1, Gp)    f32  -- packed bias [bih_r+bhh_r | bih_z+bhh_z | bih_n | bhh_n]
    out_ref: (L, Bp, H)    f32  -- new hidden states (padded batch rows are garbage)
    """
    H = hidden_size
    bf16 = jnp.bfloat16

    # Layer-0 input; layers l>0 consume the OLD hidden of layer l-1 (module quirk).
    layer_in = x_ref[...].astype(bf16)                      # (Bp, Xp)

    for layer in range(num_layers):
        h_old = h_ref[layer]                                # (Bp, Hr) exact f32
        wx_l = wx_ref[layer]                                # (Xp, Gp) bf16
        if layer > 0 and hidden_rows < wx_l.shape[0]:
            wx_l = wx_l[:hidden_rows, :]                    # rows match the (Bp, Hr) input

        # Two small MXU dots, bf16 operands, f32 accumulation.
        g = jnp.dot(layer_in, wx_l, preferred_element_type=jnp.float32)
        g = g + jnp.dot(h_old.astype(bf16), wh_ref[layer],
                        preferred_element_type=jnp.float32)
        g = g + b_ref[layer]                                # (Bp, Gp) + (1, Gp)

        # Gate slices (contiguous H-wide lane groups inside one vreg).
        r = jax.nn.sigmoid(g[:, 0 * H:1 * H])
        z = jax.nn.sigmoid(g[:, 1 * H:2 * H])
        n = jnp.tanh(g[:, 2 * H:3 * H] + r * g[:, 3 * H:4 * H])

        out_ref[layer] = ((1.0 - z) * n + z * h_old[:, :H]).astype(out_ref.dtype)

        # Next layer's input is this layer's OLD hidden state (PyTorch module semantics).
        layer_in = h_old.astype(bf16)


def init_multilayer_gru_params(key, input_size, hidden_size, num_layers,
                               dtype=jnp.float32):
    """PyTorch-style uniform(-1/sqrt(H), 1/sqrt(H)) init, PyTorch layouts."""
    params = []
    bound = 1.0 / math.sqrt(hidden_size)
    layer_in = input_size
    for _ in range(num_layers):
        key, k1, k2, k3, k4 = jax.random.split(key, 5)
        wih = jax.random.uniform(k1, (3 * hidden_size, layer_in), dtype,
                                 minval=-bound, maxval=bound)
        whh = jax.random.uniform(k2, (3 * hidden_size, hidden_size), dtype,
                                 minval=-bound, maxval=bound)
        bih = jax.random.uniform(k3, (3 * hidden_size,), dtype,
                                 minval=-bound, maxval=bound)
        bhh = jax.random.uniform(k4, (3 * hidden_size,), dtype,
                                 minval=-bound, maxval=bound)
        params.append((wih, whh, bih, bhh))
        layer_in = hidden_size
    return params


def pack_gru_params(params, input_size, hidden_size):
    """Pack per-layer (Wih, Whh, bih, bhh) into minimally padded, bf16 fused weights.

    Returns:
      wx_packed: (L, Xp, Gp) bf16   Xp = round_up(max(I, H), 16)
      wh_packed: (L, Hr, Gp) bf16   Hr = round_up(H, 16)
      b_packed : (L, 1,  Gp) f32    Gp = round_up(4*H, 128)
    Gate column layout: [0:H]=r, [H:2H]=z, [2H:3H]=gi_n, [3H:4H]=gh_n.
    """
    H = hidden_size
    Gp = _round_up(4 * H, 128)
    Xp = _round_up(max(input_size, hidden_size), 16)
    Hr = _round_up(H, 16)

    wx_layers, wh_layers, b_layers = [], [], []
    for layer, (wih, whh, bih, bhh) in enumerate(params):
        in_size = input_size if layer == 0 else hidden_size
        wih_t = wih.T.astype(jnp.float32)   # (in_size, 3H), gate order (r, z, n)
        whh_t = whh.T.astype(jnp.float32)   # (H, 3H)

        wx = jnp.zeros((Xp, Gp), jnp.float32)
        wx = wx.at[:in_size, 0 * H:1 * H].set(wih_t[:, 0 * H:1 * H])   # r
        wx = wx.at[:in_size, 1 * H:2 * H].set(wih_t[:, 1 * H:2 * H])   # z
        wx = wx.at[:in_size, 2 * H:3 * H].set(wih_t[:, 2 * H:3 * H])   # gi_n

        wh = jnp.zeros((Hr, Gp), jnp.float32)
        wh = wh.at[:H, 0 * H:1 * H].set(whh_t[:, 0 * H:1 * H])         # r
        wh = wh.at[:H, 1 * H:2 * H].set(whh_t[:, 1 * H:2 * H])         # z
        wh = wh.at[:H, 3 * H:4 * H].set(whh_t[:, 2 * H:3 * H])         # gh_n

        b = jnp.zeros((1, Gp), jnp.float32)
        b = b.at[0, 0 * H:1 * H].set(bih[0 * H:1 * H] + bhh[0 * H:1 * H])
        b = b.at[0, 1 * H:2 * H].set(bih[1 * H:2 * H] + bhh[1 * H:2 * H])
        b = b.at[0, 2 * H:3 * H].set(bih[2 * H:3 * H])
        b = b.at[0, 3 * H:4 * H].set(bhh[2 * H:3 * H])

        wx_layers.append(wx)
        wh_layers.append(wh)
        b_layers.append(b)

    wx_packed = jnp.stack(wx_layers, axis=0).astype(jnp.bfloat16)
    wh_packed = jnp.stack(wh_layers, axis=0).astype(jnp.bfloat16)
    b_packed = jnp.stack(b_layers, axis=0)
    return wx_packed, wh_packed, b_packed


def multilayer_gru_cell_forward(gru_input, gru_hidden_state_input,
                                wx_packed, wh_packed, b_packed):
    """Mirrors MultiLayer_GRU_Cell.forward (including its old-hidden input chaining)."""
    L, B, H = gru_hidden_state_input.shape
    I = gru_input.shape[-1]
    Xp = wx_packed.shape[1]
    Hr = wh_packed.shape[1]
    Gp = wx_packed.shape[2]
    assert wx_packed.shape == (L, Xp, Gp)
    assert wh_packed.shape == (L, Hr, Gp)
    assert b_packed.shape == (L, 1, Gp)

    f32 = jnp.float32
    Bp = _round_up(B, 8)   # f32 sublane tile — full-vreg loads/stores

    x_p = jnp.zeros((Bp, Xp), f32).at[:B, :I].set(gru_input.astype(f32))
    h_p = jnp.zeros((L, Bp, Hr), f32).at[:, :B, :H].set(
        gru_hidden_state_input.astype(f32))

    kernel = functools.partial(_fused_gru_kernel, num_layers=L,
                               hidden_size=H, hidden_rows=Hr)

    # Single invocation (grid = ()): every operand is a full-array VMEM block.
    out_padded = pl.pallas_call(
        kernel,
        out_shape=jax.ShapeDtypeStruct((L, Bp, H), f32),
    )(x_p, h_p, wx_packed, wh_packed, b_packed)

    gru_hidden_state = out_padded[:, :B, :].astype(gru_hidden_state_input.dtype)
    return gru_hidden_state[L - 1], gru_hidden_state


def _reference_forward(gru_input, gru_hidden_state_input, params):
    """Pure-JAX f32 reference of the PyTorch module (original, unpacked weights)."""
    L = gru_hidden_state_input.shape[0]
    new_states = []
    layer_input = gru_input
    for layer in range(L):
        wih, whh, bih, bhh = params[layer]
        h = gru_hidden_state_input[layer]
        H = h.shape[-1]
        gi = layer_input @ wih.T + bih
        gh = h @ whh.T + bhh
        r = jax.nn.sigmoid(gi[:, :H] + gh[:, :H])
        z = jax.nn.sigmoid(gi[:, H:2 * H] + gh[:, H:2 * H])
        n = jnp.tanh(gi[:, 2 * H:] + r * gh[:, 2 * H:])
        new_states.append((1.0 - z) * n + z * h)
        layer_input = gru_hidden_state_input[layer]   # same input-chaining quirk
    hs = jnp.stack(new_states, axis=0)
    return hs[L - 1], hs


if __name__ == "__main__":
    batch = 4
    input_size = 16
    hidden_size = 32
    num_layers = 3

    key = jax.random.PRNGKey(0)
    k_params, k_x, k_h = jax.random.split(key, 3)

    params = init_multilayer_gru_params(k_params, input_size, hidden_size, num_layers)
    wx_packed, wh_packed, b_packed = pack_gru_params(params, input_size, hidden_size)

    gru_input = jax.random.normal(k_x, (batch, input_size), jnp.float32)
    gru_hidden_state_input = jax.random.normal(
        k_h, (num_layers, batch, hidden_size), jnp.float32)

    last_h, all_h = multilayer_gru_cell_forward(
        gru_input, gru_hidden_state_input, wx_packed, wh_packed, b_packed)
    last_h = jax.block_until_ready(last_h)
    all_h = jax.block_until_ready(all_h)

    # Sanity check vs. f32 reference; tolerance loosened for the bf16 MXU operands.
    ref_last, ref_all = _reference_forward(gru_input, gru_hidden_state_input, params)
    assert all_h.shape == (num_layers, batch, hidden_size)
    assert last_h.shape == (batch, hidden_size)
    assert jnp.allclose(all_h, ref_all, atol=3e-2, rtol=3e-2)
    assert jnp.allclose(last_h, ref_last, atol=3e-2, rtol=3e-2)

    print("KERNEL_OK")
</pallas_src>

<mosaic_0001>
module attributes {stable_mosaic.version = 11 : i64} {
  func.func @_fused_gru_kernel(%arg0: memref<8x32xf32, #tpu.memory_space<vmem>>, %arg1: memref<3x8x32xf32, #tpu.memory_space<vmem>>, %arg2: memref<3x32x128xbf16, #tpu.memory_space<vmem>>, %arg3: memref<3x32x128xbf16, #tpu.memory_space<vmem>>, %arg4: memref<3x1x128xf32, #tpu.memory_space<vmem>>, %arg5: memref<3x8x32xf32, #tpu.memory_space<vmem>>) attributes {dimension_semantics = [], scalar_prefetch = 0 : i64, scratch_operands = 0 : i64, tpu.core_type = #tpu.core_type<tc>} {
    %c0 = arith.constant 0 : index
    %c0_0 = arith.constant 0 : index
    %0 = vector.load %arg0[%c0, %c0_0] : memref<8x32xf32, #tpu.memory_space<vmem>>, vector<8x32xf32>
    %1 = arith.truncf %0 : vector<8x32xf32> to vector<8x32xbf16>
    %c0_1 = arith.constant 0 : index
    %c0_2 = arith.constant 0 : index
    %c0_3 = arith.constant 0 : index
    %2 = vector.load %arg1[%c0_1, %c0_2, %c0_3] : memref<3x8x32xf32, #tpu.memory_space<vmem>>, vector<1x8x32xf32>
    %3 = vector.shape_cast %2 : vector<1x8x32xf32> to vector<8x32xf32>
    %c0_4 = arith.constant 0 : index
    %c0_5 = arith.constant 0 : index
    %c0_6 = arith.constant 0 : index
    %4 = vector.load %arg2[%c0_4, %c0_5, %c0_6] : memref<3x32x128xbf16, #tpu.memory_space<vmem>>, vector<1x32x128xbf16>
    %5 = vector.shape_cast %4 : vector<1x32x128xbf16> to vector<32x128xbf16>
    %cst = arith.constant dense<0.000000e+00> : vector<8x128xf32>
    %6 = tpu.matmul %1, %5, %cst {dimension_numbers = #tpu.dot_dimension_numbers<[1], [0], [0], [1], [0, 0, 1, 1], [], []>} : vector<8x32xbf16>, vector<32x128xbf16>, vector<8x128xf32> -> vector<8x128xf32>
    %7 = arith.truncf %3 : vector<8x32xf32> to vector<8x32xbf16>
    %c0_7 = arith.constant 0 : index
    %c0_8 = arith.constant 0 : index
    %c0_9 = arith.constant 0 : index
    %8 = vector.load %arg3[%c0_7, %c0_8, %c0_9] : memref<3x32x128xbf16, #tpu.memory_space<vmem>>, vector<1x32x128xbf16>
    %9 = vector.shape_cast %8 : vector<1x32x128xbf16> to vector<32x128xbf16>
    %cst_10 = arith.constant dense<0.000000e+00> : vector<8x128xf32>
    %10 = tpu.matmul %7, %9, %cst_10 {dimension_numbers = #tpu.dot_dimension_numbers<[1], [0], [0], [1], [0, 0, 1, 1], [], []>} : vector<8x32xbf16>, vector<32x128xbf16>, vector<8x128xf32> -> vector<8x128xf32>
    %11 = arith.addf %6, %10 : vector<8x128xf32>
    %c0_11 = arith.constant 0 : index
    %c0_12 = arith.constant 0 : index
    %c0_13 = arith.constant 0 : index
    %12 = vector.load %arg4[%c0_11, %c0_12, %c0_13] : memref<3x1x128xf32, #tpu.memory_space<vmem>>, vector<1x1x128xf32>
    %13 = vector.shape_cast %12 : vector<1x1x128xf32> to vector<1x128xf32>
    %14 = vector.broadcast %13 : vector<1x128xf32> to vector<8x128xf32>
    %15 = arith.addf %11, %14 : vector<8x128xf32>
    %16 = vector.extract_strided_slice %15 {offsets = [0, 0], sizes = [8, 32], strides = [1, 1]} : vector<8x128xf32> to vector<8x32xf32>
    %17 = arith.negf %16 : vector<8x32xf32>
    %18 = math.exp %17 : vector<8x32xf32>
    %cst_14 = arith.constant 1.000000e+00 : f32
    %19 = vector.broadcast %cst_14 : f32 to vector<8x32xf32>
    %20 = arith.addf %19, %18 : vector<8x32xf32>
    %21 = arith.divf %19, %20 : vector<8x32xf32>
    %22 = vector.extract_strided_slice %15 {offsets = [0, 32], sizes = [8, 32], strides = [1, 1]} : vector<8x128xf32> to vector<8x32xf32>
    %23 = arith.negf %22 : vector<8x32xf32>
    %24 = math.exp %23 : vector<8x32xf32>
    %cst_15 = arith.constant 1.000000e+00 : f32
    %25 = vector.broadcast %cst_15 : f32 to vector<8x32xf32>
    %26 = arith.addf %25, %24 : vector<8x32xf32>
    %27 = arith.divf %25, %26 : vector<8x32xf32>
    %28 = vector.extract_strided_slice %15 {offsets = [0, 64], sizes = [8, 32], strides = [1, 1]} : vector<8x128xf32> to vector<8x32xf32>
    %29 = vector.extract_strided_slice %15 {offsets = [0, 96], sizes = [8, 32], strides = [1, 1]} : vector<8x128xf32> to vector<8x32xf32>
    %30 = arith.mulf %21, %29 : vector<8x32xf32>
    %31 = arith.addf %28, %30 : vector<8x32xf32>
    %32 = math.tanh %31 : vector<8x32xf32>
    %cst_16 = arith.constant 1.000000e+00 : f32
    %33 = vector.broadcast %cst_16 : f32 to vector<8x32xf32>
    %34 = arith.subf %33, %27 : vector<8x32xf32>
    %35 = arith.mulf %34, %32 : vector<8x32xf32>
    %36 = arith.mulf %27, %3 : vector<8x32xf32>
    %37 = arith.addf %35, %36 : vector<8x32xf32>
    %c0_17 = arith.constant 0 : index
    %c0_18 = arith.constant 0 : index
    %c0_19 = arith.constant 0 : index
    %38 = vector.load %arg5[%c0_17, %c0_18, %c0_19] : memref<3x8x32xf32, #tpu.memory_space<vmem>>, vector<1x8x32xf32>
    %39 = vector.shape_cast %38 : vector<1x8x32xf32> to vector<8x32xf32>
    %40 = vector.shape_cast %37 : vector<8x32xf32> to vector<1x8x32xf32>
    tpu.vector_store %arg5[%c0_17, %c0_18, %c0_19], %40 {strides = array<i32>} : memref<3x8x32xf32, #tpu.memory_space<vmem>>, vector<1x8x32xf32>,
    %41 = arith.truncf %3 : vector<8x32xf32> to vector<8x32xbf16>
    %c1 = arith.constant 1 : index
    %c0_20 = arith.constant 0 : index
    %c0_21 = arith.constant 0 : index
    %42 = vector.load %arg1[%c1, %c0_20, %c0_21] : memref<3x8x32xf32, #tpu.memory_space<vmem>>, vector<1x8x32xf32>
    %43 = vector.shape_cast %42 : vector<1x8x32xf32> to vector<8x32xf32>
    %c1_22 = arith.constant 1 : index
    %c0_23 = arith.constant 0 : index
    %c0_24 = arith.constant 0 : index
    %44 = vector.load %arg2[%c1_22, %c0_23, %c0_24] : memref<3x32x128xbf16, #tpu.memory_space<vmem>>, vector<1x32x128xbf16>
    %45 = vector.shape_cast %44 : vector<1x32x128xbf16> to vector<32x128xbf16>
    %cst_25 = arith.constant dense<0.000000e+00> : vector<8x128xf32>
    %46 = tpu.matmul %41, %45, %cst_25 {dimension_numbers = #tpu.dot_dimension_numbers<[1], [0], [0], [1], [0, 0, 1, 1], [], []>} : vector<8x32xbf16>, vector<32x128xbf16>, vector<8x128xf32> -> vector<8x128xf32>
    %47 = arith.truncf %43 : vector<8x32xf32> to vector<8x32xbf16>
    %c1_26 = arith.constant 1 : index
    %c0_27 = arith.constant 0 : index
    %c0_28 = arith.constant 0 : index
    %48 = vector.load %arg3[%c1_26, %c0_27, %c0_28] : memref<3x32x128xbf16, #tpu.memory_space<vmem>>, vector<1x32x128xbf16>
    %49 = vector.shape_cast %48 : vector<1x32x128xbf16> to vector<32x128xbf16>
    %cst_29 = arith.constant dense<0.000000e+00> : vector<8x128xf32>
    %50 = tpu.matmul %47, %49, %cst_29 {dimension_numbers = #tpu.dot_dimension_numbers<[1], [0], [0], [1], [0, 0, 1, 1], [], []>} : vector<8x32xbf16>, vector<32x128xbf16>, vector<8x128xf32> -> vector<8x128xf32>
    %51 = arith.addf %46, %50 : vector<8x128xf32>
    %c1_30 = arith.constant 1 : index
    %c0_31 = arith.constant 0 : index
    %c0_32 = arith.constant 0 : index
    %52 = vector.load %arg4[%c1_30, %c0_31, %c0_32] : memref<3x1x128xf32, #tpu.memory_space<vmem>>, vector<1x1x128xf32>
    %53 = vector.shape_cast %52 : vector<1x1x128xf32> to vector<1x128xf32>
    %54 = vector.broadcast %53 : vector<1x128xf32> to vector<8x128xf32>
    %55 = arith.addf %51, %54 : vector<8x128xf32>
    %56 = vector.extract_strided_slice %55 {offsets = [0, 0], sizes = [8, 32], strides = [1, 1]} : vector<8x128xf32> to vector<8x32xf32>
    %57 = arith.negf %56 : vector<8x32xf32>
    %58 = math.exp %57 : vector<8x32xf32>
    %cst_33 = arith.constant 1.000000e+00 : f32
    %59 = vector.broadcast %cst_33 : f32 to vector<8x32xf32>
    %60 = arith.addf %59, %58 : vector<8x32xf32>
    %61 = arith.divf %59, %60 : vector<8x32xf32>
    %62 = vector.extract_strided_slice %55 {offsets = [0, 32], sizes = [8, 32], strides = [1, 1]} : vector<8x128xf32> to vector<8x32xf32>
    %63 = arith.negf %62 : vector<8x32xf32>
    %64 = math.exp %63 : vector<8x32xf32>
    %cst_34 = arith.constant 1.000000e+00 : f32
    %65 = vector.broadcast %cst_34 : f32 to vector<8x32xf32>
    %66 = arith.addf %65, %64 : vector<8x32xf32>
    %67 = arith.divf %65, %66 : vector<8x32xf32>
    %68 = vector.extract_strided_slice %55 {offsets = [0, 64], sizes = [8, 32], strides = [1, 1]} : vector<8x128xf32> to vector<8x32xf32>
    %69 = vector.extract_strided_slice %55 {offsets = [0, 96], sizes = [8, 32], strides = [1, 1]} : vector<8x128xf32> to vector<8x32xf32>
    %70 = arith.mulf %61, %69 : vector<8x32xf32>
    %71 = arith.addf %68, %70 : vector<8x32xf32>
    %72 = math.tanh %71 : vector<8x32xf32>
    %cst_35 = arith.constant 1.000000e+00 : f32
    %73 = vector.broadcast %cst_35 : f32 to vector<8x32xf32>
    %74 = arith.subf %73, %67 : vector<8x32xf32>
    %75 = arith.mulf %74, %72 : vector<8x32xf32>
    %76 = arith.mulf %67, %43 : vector<8x32xf32>
    %77 = arith.addf %75, %76 : vector<8x32xf32>
    %c1_36 = arith.constant 1 : index
    %c0_37 = arith.constant 0 : index
    %c0_38 = arith.constant 0 : index
    %78 = vector.load %arg5[%c1_36, %c0_37, %c0_38] : memref<3x8x32xf32, #tpu.memory_space<vmem>>, vector<1x8x32xf32>
    %79 = vector.shape_cast %78 : vector<1x8x32xf32> to vector<8x32xf32>
    %80 = vector.shape_cast %77 : vector<8x32xf32> to vector<1x8x32xf32>
    tpu.vector_store %arg5[%c1_36, %c0_37, %c0_38], %80 {strides = array<i32>} : memref<3x8x32xf32, #tpu.memory_space<vmem>>, vector<1x8x32xf32>,
    %81 = arith.truncf %43 : vector<8x32xf32> to vector<8x32xbf16>
    %c2 = arith.constant 2 : index
    %c0_39 = arith.constant 0 : index
    %c0_40 = arith.constant 0 : index
    %82 = vector.load %arg1[%c2, %c0_39, %c0_40] : memref<3x8x32xf32, #tpu.memory_space<vmem>>, vector<1x8x32xf32>
    %83 = vector.shape_cast %82 : vector<1x8x32xf32> to vector<8x32xf32>
    %c2_41 = arith.constant 2 : index
    %c0_42 = arith.constant 0 : index
    %c0_43 = arith.constant 0 : index
    %84 = vector.load %arg2[%c2_41, %c0_42, %c0_43] : memref<3x32x128xbf16, #tpu.memory_space<vmem>>, vector<1x32x128xbf16>
    %85 = vector.shape_cast %84 : vector<1x32x128xbf16> to vector<32x128xbf16>
    %cst_44 = arith.constant dense<0.000000e+00> : vector<8x128xf32>
    %86 = tpu.matmul %81, %85, %cst_44 {dimension_numbers = #tpu.dot_dimension_numbers<[1], [0], [0], [1], [0, 0, 1, 1], [], []>} : vector<8x32xbf16>, vector<32x128xbf16>, vector<8x128xf32> -> vector<8x128xf32>
    %87 = arith.truncf %83 : vector<8x32xf32> to vector<8x32xbf16>
    %c2_45 = arith.constant 2 : index
    %c0_46 = arith.constant 0 : index
    %c0_47 = arith.constant 0 : index
    %88 = vector.load %arg3[%c2_45, %c0_46, %c0_47] : memref<3x32x128xbf16, #tpu.memory_space<vmem>>, vector<1x32x128xbf16>
    %89 = vector.shape_cast %88 : vector<1x32x128xbf16> to vector<32x128xbf16>
    %cst_48 = arith.constant dense<0.000000e+00> : vector<8x128xf32>
    %90 = tpu.matmul %87, %89, %cst_48 {dimension_numbers = #tpu.dot_dimension_numbers<[1], [0], [0], [1], [0, 0, 1, 1], [], []>} : vector<8x32xbf16>, vector<32x128xbf16>, vector<8x128xf32> -> vector<8x128xf32>
    %91 = arith.addf %86, %90 : vector<8x128xf32>
    %c2_49 = arith.constant 2 : index
    %c0_50 = arith.constant 0 : index
    %c0_51 = arith.constant 0 : index
    %92 = vector.load %arg4[%c2_49, %c0_50, %c0_51] : memref<3x1x128xf32, #tpu.memory_space<vmem>>, vector<1x1x128xf32>
    %93 = vector.shape_cast %92 : vector<1x1x128xf32> to vector<1x128xf32>
    %94 = vector.broadcast %93 : vector<1x128xf32> to vector<8x128xf32>
    %95 = arith.addf %91, %94 : vector<8x128xf32>
    %96 = vector.extract_strided_slice %95 {offsets = [0, 0], sizes = [8, 32], strides = [1, 1]} : vector<8x128xf32> to vector<8x32xf32>
    %97 = arith.negf %96 : vector<8x32xf32>
    %98 = math.exp %97 : vector<8x32xf32>
    %cst_52 = arith.constant 1.000000e+00 : f32
    %99 = vector.broadcast %cst_52 : f32 to vector<8x32xf32>
    %100 = arith.addf %99, %98 : vector<8x32xf32>
    %101 = arith.divf %99, %100 : vector<8x32xf32>
    %102 = vector.extract_strided_slice %95 {offsets = [0, 32], sizes = [8, 32], strides = [1, 1]} : vector<8x128xf32> to vector<8x32xf32>
    %103 = arith.negf %102 : vector<8x32xf32>
    %104 = math.exp %103 : vector<8x32xf32>
    %cst_53 = arith.constant 1.000000e+00 : f32
    %105 = vector.broadcast %cst_53 : f32 to vector<8x32xf32>
    %106 = arith.addf %105, %104 : vector<8x32xf32>
    %107 = arith.divf %105, %106 : vector<8x32xf32>
    %108 = vector.extract_strided_slice %95 {offsets = [0, 64], sizes = [8, 32], strides = [1, 1]} : vector<8x128xf32> to vector<8x32xf32>
    %109 = vector.extract_strided_slice %95 {offsets = [0, 96], sizes = [8, 32], strides = [1, 1]} : vector<8x128xf32> to vector<8x32xf32>
    %110 = arith.mulf %101, %109 : vector<8x32xf32>
    %111 = arith.addf %108, %110 : vector<8x32xf32>
    %112 = math.tanh %111 : vector<8x32xf32>
    %cst_54 = arith.constant 1.000000e+00 : f32
    %113 = vector.broadcast %cst_54 : f32 to vector<8x32xf32>
    %114 = arith.subf %113, %107 : vector<8x32xf32>
    %115 = arith.mulf %114, %112 : vector<8x32xf32>
    %116 = arith.mulf %107, %83 : vector<8x32xf32>
    %117 = arith.addf %115, %116 : vector<8x32xf32>
    %c2_55 = arith.constant 2 : index
    %c0_56 = arith.constant 0 : index
    %c0_57 = arith.constant 0 : index
    %118 = vector.load %arg5[%c2_55, %c0_56, %c0_57] : memref<3x8x32xf32, #tpu.memory_space<vmem>>, vector<1x8x32xf32>
    %119 = vector.shape_cast %118 : vector<1x8x32xf32> to vector<8x32xf32>
    %120 = vector.shape_cast %117 : vector<8x32xf32> to vector<1x8x32xf32>
    tpu.vector_store %arg5[%c2_55, %c0_56, %c0_57], %120 {strides = array<i32>} : memref<3x8x32xf32, #tpu.memory_space<vmem>>, vector<1x8x32xf32>,
    return
  }
}

</mosaic_0001>

<bundles_post_ra>
// kernel: tpu_custom_call.1
= control target key start
LH: loop header
LB: loop body
LE: loop exit
PB: predicated region body
PF: predicated region fallthrough
CT: control target
= control target key end

     0   :  { %10 = vsyncpa [#allocation3], 0  ;;  %s825_s0 = inlined_call_operand.hbm [shape: f32[8,32], index: 0, kind: input, shape index: {}]   ;;  %s826_s1 = inlined_call_operand.hbm [shape: f32[3,8,32], index: 1, kind: input, shape index: {}]   ;;  %s827_s2 = inlined_call_operand.hbm [shape: bf16[3,32,128], index: 2, kind: input, shape index: {}]   ;;  %s828_s3 = inlined_call_operand.hbm [shape: bf16[3,32,128], index: 3, kind: input, shape index: {}]   ;;  %s829_s4 = inlined_call_operand.vmem [shape: f32[3,1,128], index: 4, kind: input, shape index: {}]   ;;  %s830_s5 = inlined_call_operand.hbm [shape: f32[3,8,32], index: 5, kind: output, shape index: {}]  }
   0x1   :  { %11 = vsyncpa [#allocation6], 0 }
   0x2   :  { %12 = vsyncpa [#allocation9], 0  ;;  %s29_s20 = sshll.u32 %s826_s1, 4  ;;  %s30_s20 = int_to_ptr.hbm [resolvable:$true] %s29_s20 }
   0x3   :  { %13 = vsyncpa [#allocation4], 0  ;;  %s696_s21 = smov [#allocation5]   ;;  %s19_s25 = sshll.u32 %s825_s0, 4  ;;  %s20_s25 = int_to_ptr.hbm [resolvable:$true] %s19_s25 }
   0x4   :  { %s31_s22 = sshll.u32 %s696_s21, 4  ;;  %s697_s26 = smov 128   ;;  %s32_s22 = int_to_ptr.vmem [resolvable:$true] %s31_s22 }
   0x5   :  { %s698_s27 = smov 8   ;;  %s699_s28 = smov [#allocation2]  }
   0x6   :  { %37 = dma.hbm_to_vmem [thread:$0]  %s30_s20, 384, %s32_s22, [#allocation6], %s697_s26, %s697_s26, %s698_s27  }
   0x7   :  { %s21_s29 = sshll.u32 %s699_s28, 4  ;;  %s42_s6 = sshll.u32 %s827_s2, 4  ;;  %s22_s29 = int_to_ptr.vmem [resolvable:$true] %s21_s29  ;;  %s43_s6 = int_to_ptr.hbm [resolvable:$true] %s42_s6 }
   0x8   :  { %24 = dma.hbm_to_vmem [thread:$0]  %s20_s25, 128, %s22_s29, [#allocation3]  }
   0x9   :  { %s700_s7 = smov [#allocation7]   ;;  %s55_s10 = sshll.u32 %s828_s3, 4  ;;  %s56_s10 = int_to_ptr.hbm [resolvable:$true] %s55_s10 }
   0xa   :  { %s44_s8 = sshll.u32 %s700_s7, 4  ;;  %s701_s11 = smov 64   ;;  %s45_s8 = int_to_ptr.vmem [resolvable:$true] %s44_s8 }
   0xb   :  { %s702_s12 = smov 4   ;;  %s703_s13 = smov [#allocation8]  }
   0xc   :  { %50 = dma.hbm_to_vmem [thread:$0]  %s43_s6, 768, %s45_s8, [#allocation6], %s701_s11, %s701_s11, %s702_s12  }
   0xd   :  { %s57_s14 = sshll.u32 %s703_s13, 4  ;;  %s58_s14 = int_to_ptr.vmem [resolvable:$true] %s57_s14 }
   0xe   :  { %63 = dma.hbm_to_vmem [thread:$0]  %s56_s10, 768, %s58_s14, [#allocation9], %s701_s11, %s701_s11, %s702_s12  }
   0xf   :  { %688 = dma.done.wait [#allocation3], 128  }
  0x10   :  { %689 = vsyncadd [#allocation3], 4294967168 }
  0x11   :  { %690 = dma.done.wait [#allocation6], 1152  }
  0x12   :  { %691 = vsyncadd [#allocation6], 4294966144 }
  0x13   :  { %692 = dma.done.wait [#allocation9], 768  }
  0x14   :  { %693 = vsyncadd [#allocation9], 4294966528  ;;  %v527_v0 = vld [vmem:[#allocation8 + $0x8] sm:$0xff]  ;;  %v525_v1 = vld [vmem:[#allocation7 + $0x8] sm:$0xff]  ;;  %vm107_vm0 = vcmask 261120   ;;  %s704_s15 = smov 32  }
  0x15   :  { %v531_v2 = vld [vmem:[#allocation8 + $0x18] sm:$0xff]  ;;  %v529_v3 = vld [vmem:[#allocation7 + $0x18] sm:$0xff]  ;;  %v526_v4 = vld [vmem:[#allocation8] sm:$0xff]  ;;  %117 = vmatpush.bf16.msra.mxu0 %v527_v0  ;;  %145 = vmatpush.bf16.msra.mxu1 %v525_v1  ;;  %s706_s20 = smov [#allocation10]   ;;  %s450_s24 = sshll.u32 %s830_s5, 4  ;;  %s451_s24 = int_to_ptr.hbm [resolvable:$true] %s450_s24 }
  0x16   :  { %v524_v5 = vld [vmem:[#allocation7] sm:$0xff]  ;;  %v756_v7 = vld [vmem:[#allocation5] sm:$0xff]  ;;  %238 = vmatpush.bf16.msra.mxu2 %v531_v2  ;;  %263 = vmatpush.bf16.msra.mxu3 %v529_v3  ;;  %v528_v8 = vld [vmem:[#allocation7 + $0x10] sm:$0xff]  ;;  %s448_s21 = sshll.u32 %s706_s20, 4  ;;  %s449_s21 = int_to_ptr.vmem [resolvable:$true] %s448_s21 }
  0x17   :  { %v530_v6 = vld [vmem:[#allocation8 + $0x10] sm:$0xff]  ;;  %v758_v10 = vld [vmem:[#allocation5 + $0x8] sm:$0xff]  ;;  %v535_v11 = vld [vmem:[#allocation8 + $0x28] sm:$0xff]  ;;  %v90_v13 = vpack.c.bf16 %v756_v7, %v756_v7 }
  0x18   :  { %v83_v9 = vld [vmem:[#allocation2] sm:$0xff]  ;;  %v533_v12 = vld [vmem:[#allocation7 + $0x28] sm:$0xff]  ;;  %v211_v15 = vpack.c.bf16 %v758_v10, %v758_v10  ;;  %v534_v16 = vld [vmem:[#allocation8 + $0x20] sm:$0xff] }
  0x19   :  { %v84_v14 = vpack.c.bf16 %v83_v9, %v83_v9  ;;  %118 = vmatpush.bf16.msra.mxu0 %v526_v4  ;;  %146 = vmatpush.bf16.msra.mxu1 %v524_v5  ;;  %v532_v17 = vld [vmem:[#allocation7 + $0x20] sm:$0xff]  ;;  %v768_v18 = vld [vmem:[#allocation5 + $0x10] sm:$0xff] }
  0x1a   :  { %239 = vmatpush.bf16.msra.mxu2 %v530_v6  ;;  %264 = vmatpush.bf16.msra.mxu3 %v528_v8  ;;  %v331_v19 = vpack.c.bf16 %v768_v18, %v768_v18  ;;  %v547_v20 = vld [vmem:[%s829_s4] ss:$0 sm:$0xff]  ;;  %v548_v25 = vld [vmem:[%s829_s4 + $0x1] ss:$0 sm:$0xff]  ;;  %v549_v32 = vld [vmem:[%s829_s4 + $0x2] ss:$0 sm:$0xff] }
  0x1b   :  { %s705_s4 = smov 96  }
  0x1c   :  { %473 = vmatmul.msk.bf16.vlgmr.msra.gmra.mxu0 %vm107_vm0, %v90_v13  ;;  %482 = vmatmul.msk.bf16.vlgmr.msra.gmra.mxu1 %vm107_vm0, %v84_v14 }
  0x1d   :  { %358 = vmatpush.bf16.msrb.mxu0 %v535_v11  ;;  %383 = vmatpush.bf16.msrb.mxu1 %v533_v12 }
  0x1e   :  { %492 = vmatmul.msk.bf16.vlgmr.msra.gmra.mxu2 %vm107_vm0, %v211_v15  ;;  %501 = vmatmul.msk.bf16.vlgmr.msra.gmra.mxu3 %vm107_vm0, %v90_v13 }
  0x21   :  { %359 = vmatpush.bf16.msrb.mxu0 %v534_v16  ;;  %384 = vmatpush.bf16.msrb.mxu1 %v532_v17 }
  0x2c   :  { %512 = vmatmul.msk.bf16.vlgmr.msrb.gmra.mxu0 %vm107_vm0, %v331_v19  ;;  %521 = vmatmul.msk.bf16.vlgmr.msrb.gmra.mxu1 %vm107_vm0, %v211_v15 }
  0x99   :  { %v120_v21 = vpop.f32.mrf.mxu0  ;;  %v148_v22 = vpop.f32.mrf.mxu1 }
  0x9a   :  { %v149_v23 = vadd.f32 %v148_v22, %v120_v21 }
  0x9c   :  { %v777_v24 = vadd.f32 %v547_v20, %v149_v23 }
  0x9e   :  { %177 = vrot.lane.b32.xlu0 %v777_v24, %s704_s15  ;;  %v483_v41 = vmul.f32 -1.442695, %v777_v24 }
  0xa0   :  { %550 = vpow2.f32 %v483_v41 }
  0xa1   :  { %v241_v26 = vpop.f32.mrf.mxu2  ;;  %v266_v27 = vpop.f32.mrf.mxu3 }
  0xa2   :  { %v122_v28 = vpop.f32.mrf.mxu0  ;;  %v150_v29 = vpop.f32.mrf.mxu1  ;;  %v267_v30 = vadd.f32 %v266_v27, %v241_v26 }
  0xa4   :  { %v784_v31 = vadd.f32 %v548_v25, %v267_v30 }
  0xa6   :  { %296 = vrot.lane.b32.xlu0 %v784_v31, %s704_s15  ;;  %v503_v42 = vmul.f32 -1.442695, %v784_v31  ;;  %v551_v43 = vpop.eup %550 }
  0xa7   :  { %v160_v44 = vadd.f32 1.0, %v551_v43 }
  0xa8   :  { %552 = vpow2.f32 %v503_v42 }
  0xa9   :  { %v243_v33 = vpop.f32.mrf.mxu2  ;;  %v268_v34 = vpop.f32.mrf.mxu3  ;;  %554 = vrcp.f32 %v160_v44  ;;  %v172_v59 = vand.u32 2147483648, %v160_v44  ;;  %vm166_vm2 = vweird.f32 %v160_v44  ;;  %v170_v60 = vand.u32 2147483647, %v160_v44 }
  0xaa   :  { %v361_v35 = vpop.f32.mrf.mxu0  ;;  %v386_v36 = vpop.f32.mrf.mxu1 }
  0xab   :  { %v387_v37 = vadd.f32 %v386_v36, %v361_v35  ;;  %v173_v0 = vor.u32 1.1754944e-38, %v172_v59  ;;  %vm171_vm4 = vcmp.eq.f32.partialorder %v170_v60, 8.507059e+37 }
  0xad   :  { %v791_v38 = vadd.f32 %v549_v32, %v387_v37 }
  0xae   :  { %v553_v46 = vpop.eup %552 }
  0xaf   :  { %416 = vrot.lane.b32.xlu1 %v791_v38, %s704_s15  ;;  %v523_v45 = vmul.f32 -1.442695, %v791_v38  ;;  %v279_v47 = vadd.f32 1.0, %v553_v46  ;;  %v555_v48 = vpop.eup %554 }
  0xb0   :  { %v162_v50 = vmul.f32 %v555_v48, %v160_v44  ;;  %vm167_vm1 = vweird.f32 %v555_v48 }
  0xb1   :  { %556 = vpow2.f32 %v523_v45  ;;  %vm168_vm3 = vmor %vm166_vm2, %vm167_vm1  ;;  %vm285_vm5 = vweird.f32 %v279_v47  ;;  %v291_v3 = vand.u32 2147483648, %v279_v47  ;;  %v289_v6 = vand.u32 2147483647, %v279_v47 }
  0xb2   :  { %v363_v39 = vpop.f32.mrf.mxu0  ;;  %v388_v40 = vpop.f32.mrf.mxu1  ;;  %558 = vrcp.f32 %v279_v47  ;;  %v163_v52 = vsub.f32 1.0, %v162_v50 }
  0xb3   :  { %v292_v9 = vor.u32 1.1754944e-38, %v291_v3  ;;  %vm290_vm8 = vcmp.eq.f32.partialorder %v289_v6, 8.507059e+37 }
  0xb4   :  { %v164_v54 = vmul.f32 %v555_v48, %v163_v52 }
  0xb6   :  { %v165_v56 = vadd.f32 %v555_v48, %v164_v54 }
  0xb7   :  { %v557_v49 = vpop.eup %556 }
  0xb8   :  { %v399_v51 = vadd.f32 1.0, %v557_v49  ;;  %v559_v53 = vpop.eup %558  ;;  %v169_v61 = vsel %vm168_vm3, %v555_v48, %v165_v56 }
  0xb9   :  { %v281_v55 = vmul.f32 %v559_v53, %v279_v47  ;;  %vm286_vm6 = vweird.f32 %v559_v53  ;;  %v174_v2 = vsel %vm171_vm4, %v173_v0, %v169_v61 }
  0xba   :  { %560 = vrcp.f32 %v399_v51  ;;  %vm287_vm7 = vmor %vm285_vm5, %vm286_vm6  ;;  %vm405_vm9 = vweird.f32 %v399_v51  ;;  %v411_v15 = vand.u32 2147483648, %v399_v51  ;;  %v409_v19 = vand.u32 2147483647, %v399_v51 }
  0xbb   :  { %v282_v57 = vsub.f32 1.0, %v281_v55 }
  0xbc   :  { %v412_v20 = vor.u32 1.1754944e-38, %v411_v15  ;;  %vm410_vm12 = vcmp.eq.f32.partialorder %v409_v19, 8.507059e+37 }
  0xbd   :  { %v283_v62 = vmul.f32 %v559_v53, %v282_v57 }
  0xbf   :  { %v284_v5 = vadd.f32 %v559_v53, %v283_v62 }
  0xc0   :  { %v561_v58 = vpop.eup %560 }
  0xc1   :  { %v401_v63 = vmul.f32 %v561_v58, %v399_v51  ;;  %v288_v11 = vsel %vm287_vm7, %v559_v53, %v284_v5  ;;  %vm406_vm10 = vweird.f32 %v561_v58 }
  0xc2   :  { %v293_v14 = vsel %vm290_vm8, %v292_v9, %v288_v11  ;;  %vm407_vm11 = vmor %vm405_vm9, %vm406_vm10 }
  0xc3   :  { %v402_v8 = vsub.f32 1.0, %v401_v63  ;;  %v306_v45 = vsub.f32 1.0, %v293_v14 }
  0xc5   :  { %v403_v12 = vmul.f32 %v561_v58, %v402_v8 }
  0xc7   :  { %v404_v17 = vadd.f32 %v561_v58, %v403_v12 }
  0xc9   :  { %v408_v21 = vsel %vm407_vm11, %v561_v58, %v404_v17 }
  0xca   :  { %v413_v23 = vsel %vm410_vm12, %v412_v20, %v408_v21 }
  0xcb   :  { %v426_v37 = vsub.f32 1.0, %v413_v23 }
 0x110   :  { %v178_v1 = vpop.permute.xlu0 %177 }
 0x111   :  { %v180_v4 = vmul.f32 %v178_v1, %v174_v2 }
 0x113   :  { %182 = vrot.lane.b32.xlu1 %v180_v4, %s701_s11 }
 0x118   :  { %v297_v13 = vpop.permute.xlu0 %296 }
 0x119   :  { %v299_v16 = vmul.f32 %v297_v13, %v293_v14 }
 0x11b   :  { %301 = vrot.lane.b32.xlu2 %v299_v16, %s701_s11  ;;  %194 = vrot.lane.b32.xlu1 %v756_v7, %s704_s15 }
 0x121   :  { %v417_v22 = vpop.permute.xlu1 %416 }
 0x122   :  { %v419_v25 = vmul.f32 %v417_v22, %v413_v23 }
 0x124   :  { %421 = vrot.lane.b32.xlu2 %v419_v25, %s701_s11 }
 0x175   :  { %v302_v26 = vpop.permute.xlu2 %301 }
 0x176   :  { %v304_v27 = vadd.f32 %v302_v26, %v784_v31 }
 0x178   :  { %562 = vtanh.f32 %v304_v27 }
 0x17e   :  { %v422_v28 = vpop.permute.xlu2 %421  ;;  %v563_v29 = vpop.eup %562 }
 0x17f   :  { %v424_v30 = vadd.f32 %v422_v28, %v791_v38  ;;  %308 = vrot.lane.b32.xlu2 %v563_v29, %s705_s4 }
 0x181   :  { %564 = vtanh.f32 %v424_v30 }
 0x185   :  { %v183_v7 = vpop.permute.xlu1 %182 }
 0x186   :  { %v185_v33 = vadd.f32 %v183_v7, %v777_v24 }
 0x187   :  { %v565_v32 = vpop.eup %564  ;;  %433 = vrot.lane.b32.xlu2 %v768_v18, %s704_s15  ;;  %v187_v18 = vsub.f32 1.0, %v174_v2 }
 0x188   :  { %428 = vrot.lane.b32.xlu1 %v565_v32, %s705_s4  ;;  %566 = vtanh.f32 %v185_v33 }
 0x18d   :  { %v195_v35 = vpop.permute.xlu1 %194 }
 0x18e   :  { %v567_v31 = vpop.eup %566  ;;  %v197_v42 = vmul.f32 %v195_v35, %v174_v2 }
 0x18f   :  { %189 = vrot.lane.b32.xlu0 %v567_v31, %s705_s4 }
 0x197   :  { %313 = vrot.lane.b32.xlu0 %v758_v10, %s704_s15 }
 0x1d9   :  { %v309_v34 = vpop.permute.xlu2 %308 }
 0x1da   :  { %v311_v10 = vmul.f32 %v309_v34, %v306_v45 }
 0x1e1   :  { %v434_v36 = vpop.permute.xlu2 %433 }
 0x1e2   :  { %v436_v39 = vmul.f32 %v434_v36, %v413_v23 }
 0x1fa   :  { %v429_v38 = vpop.permute.xlu1 %428 }
 0x1fb   :  { %v431_v40 = vmul.f32 %v429_v38, %v426_v37 }
 0x1fd   :  { %v437_v24 = vadd.f32 %v436_v39, %v431_v40 }
 0x1ff   :  { %439 = vrot.lane.b32.xlu2 %v437_v24, %s705_s4 }
 0x201   :  { %v190_v41 = vpop.permute.xlu0 %189 }
 0x202   :  { %v192_v43 = vmul.f32 %v190_v41, %v187_v18 }
 0x204   :  { %v198_v44 = vadd.f32 %v197_v42, %v192_v43 }
 0x206   :  { %200 = vrot.lane.b32.xlu0 %v198_v44, %s705_s4 }
 0x209   :  { %v314_v46 = vpop.permute.xlu0 %313 }
 0x20a   :  { %v316_v47 = vmul.f32 %v314_v46, %v293_v14 }
 0x20c   :  { %v317_v48 = vadd.f32 %v316_v47, %v311_v10 }
 0x20e   :  { %319 = vrot.lane.b32.xlu1 %v317_v48, %s705_s4 }
 0x259   :  { %v440_v49 = vpop.permute.xlu2 %439 }
 0x25a   :  { %443 = vst.msk [vmem:[#allocation10 + $0x10] sm:$0xff] %vm107_vm0, %v440_v49 }
 0x278   :  { %v201_v50 = vpop.permute.xlu0 %200 }
 0x279   :  { %203 = vst.msk [vmem:[#allocation10] sm:$0xff] %vm107_vm0, %v201_v50 }
 0x280   :  { %v320_v51 = vpop.permute.xlu1 %319 }
 0x281   :  { %323 = vst.msk [vmem:[#allocation10 + $0x8] sm:$0xff] %vm107_vm0, %v320_v51 }
 0x282   :  { %456 = dma.vmem_to_hbm [thread:$0]  %s449_s21, 384, %s451_s24, [#allocation4], %s697_s26, %s697_s26, %s698_s27  }
 0x283   :  { %694 = dma.done.wait [#allocation4], 384  }
 0x284   :  { %695 = vsyncadd [#allocation4], 4294966912 }
 0x285   :  { %461 = vsyncpa [#allocation3], 1 }
 0x286   :  { %462 = vsyncpa [#allocation6], 1 }
 0x287   :  { %463 = vsyncpa [#allocation9], 1 }
 0x288   :  { %464 = vsyncpa [#allocation4], 1 }

</bundles_post_ra>
